<compile_context>
chip_gen: v7x
topology: tpu7x:2x2x1
jax: 0.10.0
libtpu: 0.0.40
codegen_flags: <defaults>
</compile_context>

<pallas_src>
import jax
import jax.numpy as jnp
from jax.experimental import pallas as pl
from jax.experimental.pallas import tpu as pltpu


def _round_up(n, m):
    return ((n + m - 1) // m) * m


def _choose_batch_tile(B, row_in_bytes, row_out_bytes, weight_bytes):
    """Batch tile: biggest tile whose double-buffered x/out tiles + resident
    weights fit a conservative 16 MiB VMEM budget (v5e default scoped limit),
    capped at 512 rows, and small enough that B >= 16 gives >= 2 grid steps
    (so v7x's 2 TensorCores both get work; neutral on single-TC v5e/v6e)."""
    if B <= 8:
        return B  # single full-array block — always a legal block shape
    budget = 16 * 1024 * 1024
    per_row = 2 * (row_in_bytes + row_out_bytes)  # 2x: double-buffered by Pallas
    cap = max(8, (budget - weight_bytes) // max(per_row, 1))
    cap = min((cap // 8) * 8, 512)
    tb = _round_up(pl.cdiv(B, 2), 8)              # >= 2 grid steps
    return max(8, min(tb, cap))


def agent_kernel(x_ref, wa_ref, wb_ref, o_ref):
    # x: (TB, in)  wa: (in, hidden)  wb: (hidden, out) — both dots canonical,
    # bf16 operands, f32 accumulation on the MXU.
    x = x_ref[...]

    h = jnp.dot(x, wa_ref[...], preferred_element_type=jnp.float32)
    h = jnp.maximum(h, 0.0)

    logits = jnp.dot(h.astype(wb_ref.dtype), wb_ref[...],
                     preferred_element_type=jnp.float32)

    # Max-subtracted softmax, exact f32 division (rows sum to 1 to ~ulp).
    m = jnp.max(logits, axis=-1, keepdims=True)
    e = jnp.exp(logits - m)
    denom = jnp.sum(e, axis=-1, keepdims=True)
    o_ref[...] = (e / denom).astype(o_ref.dtype)


def agent_forward(x, w_a, w_b, compute_dtype=jnp.bfloat16):
    """x: (B, input_size); w_a: (hidden, input_size); w_b: (output, hidden)
    — torch.nn.Linear (out_features, in_features) layout.  Returns f32
    softmax probabilities of shape (B, output_size)."""
    B, in_size = x.shape
    hidden, in_size_a = w_a.shape
    out_size, hidden_b = w_b.shape
    assert in_size_a == in_size and hidden_b == hidden

    # One-time layout/dtype prep (amortized; for non-toy deployments store the
    # weights pre-transposed / pre-cast and skip this).
    x_c = x.astype(compute_dtype)
    wa_t = w_a.T.astype(compute_dtype)   # (in, hidden)
    wb_t = w_b.T.astype(compute_dtype)   # (hidden, out)

    dt_bytes = jnp.dtype(compute_dtype).itemsize
    TB = _choose_batch_tile(
        B,
        row_in_bytes=in_size * dt_bytes,
        row_out_bytes=out_size * 4,
        weight_bytes=(wa_t.size + wb_t.size) * dt_bytes,
    )

    return pl.pallas_call(
        agent_kernel,
        out_shape=jax.ShapeDtypeStruct((B, out_size), jnp.float32),
        grid_spec=pl.GridSpec(
            grid=(pl.cdiv(B, TB),),
            in_specs=[
                pl.BlockSpec((TB, in_size), lambda i: (i, 0)),       # x tile
                pl.BlockSpec((in_size, hidden), lambda i: (0, 0)),   # Wa^T resident
                pl.BlockSpec((hidden, out_size), lambda i: (0, 0)),  # Wb^T resident
            ],
            out_specs=pl.BlockSpec((TB, out_size), lambda i: (i, 0)),
        ),
        compiler_params=pltpu.CompilerParams(
            # Batch axis is independent -> shardable across both TCs on v7x;
            # neutral on single-TC v5e/v6e.
            dimension_semantics=("parallel",),
        ),
    )(x_c, wa_t, wb_t)


def _torch_linear_init(key, out_features, in_features):
    # Mimic nn.Linear default init: U(-1/sqrt(in), 1/sqrt(in))
    bound = 1.0 / (in_features ** 0.5)
    return jax.random.uniform(
        key, (out_features, in_features), dtype=jnp.float32,
        minval=-bound, maxval=bound,
    )


def reference_forward(x, w_a, w_b, compute_dtype=jnp.float32):
    """Pure-JAX reference with the same dtype handling as the kernel."""
    xc = x.astype(compute_dtype)
    wa_t = w_a.T.astype(compute_dtype)
    wb_t = w_b.T.astype(compute_dtype)
    h = jnp.maximum(jnp.dot(xc, wa_t, preferred_element_type=jnp.float32), 0.0)
    logits = jnp.dot(h.astype(compute_dtype), wb_t,
                     preferred_element_type=jnp.float32)
    m = jnp.max(logits, axis=-1, keepdims=True)
    e = jnp.exp(logits - m)
    return e / jnp.sum(e, axis=-1, keepdims=True)


if __name__ == "__main__":
    input_size, hidden_size, output_size = 16, 32, 8
    batch = 4

    key = jax.random.PRNGKey(0)
    kx, ka, kb = jax.random.split(key, 3)

    x = jax.random.normal(kx, (batch, input_size), dtype=jnp.float32)
    w_a = _torch_linear_init(ka, hidden_size, input_size)
    w_b = _torch_linear_init(kb, output_size, hidden_size)

    out = agent_forward(x, w_a, w_b)             # bf16 MXU, f32 epilogue
    out = jax.block_until_ready(out)
    assert out.shape == (batch, output_size)

    # Tight check vs a reference with identical (bf16-input) dtype handling.
    ref_same = reference_forward(x, w_a, w_b, compute_dtype=jnp.bfloat16)
    assert jnp.allclose(out, ref_same, atol=1e-5, rtol=1e-5), \
        "mismatch vs same-precision JAX reference"

    # Looser check vs the pure-f32 (torch-semantics) reference: bf16 inputs
    # with f32 accumulation keep probabilities within ~1e-3.
    ref_f32 = reference_forward(x, w_a, w_b, compute_dtype=jnp.float32)
    assert jnp.allclose(out, ref_f32, atol=2e-2, rtol=2e-2), \
        "mismatch vs f32 JAX reference"

    # Exact softmax division -> rows sum to 1 to within float rounding.
    assert jnp.allclose(jnp.sum(out, axis=-1), 1.0, atol=1e-4), \
        "softmax rows must sum to ~1"

    print("KERNEL_OK")
</pallas_src>

<mosaic_0001>
module attributes {stable_mosaic.version = 11 : i64} {
  func.func @agent_kernel(%arg0: i32, %arg1: memref<4x16xbf16, #tpu.memory_space<vmem>>, %arg2: memref<16x32xbf16, #tpu.memory_space<vmem>>, %arg3: memref<32x8xbf16, #tpu.memory_space<vmem>>, %arg4: memref<4x8xf32, #tpu.memory_space<vmem>>) attributes {dimension_semantics = [#tpu.dimension_semantics<parallel>], iteration_bounds = array<i64: 1>, scalar_prefetch = 0 : i64, scratch_operands = 0 : i64, tpu.core_type = #tpu.core_type<tc>, window_params = [{transform_indices = @transform_0, window_bounds = array<i64: 4, 16>}, {pipeline_mode = #tpu.pipeline_mode<synchronous>, transform_indices = @transform_1, window_bounds = array<i64: 16, 32>}, {pipeline_mode = #tpu.pipeline_mode<synchronous>, transform_indices = @transform_2, window_bounds = array<i64: 32, 8>}, {transform_indices = @transform_3, window_bounds = array<i64: 4, 8>}]} {
    %c0 = arith.constant 0 : index
    %c0_0 = arith.constant 0 : index
    %0 = vector.load %arg1[%c0, %c0_0] : memref<4x16xbf16, #tpu.memory_space<vmem>>, vector<4x16xbf16>
    %c0_1 = arith.constant 0 : index
    %c0_2 = arith.constant 0 : index
    %1 = vector.load %arg2[%c0_1, %c0_2] : memref<16x32xbf16, #tpu.memory_space<vmem>>, vector<16x32xbf16>
    %cst = arith.constant dense<0.000000e+00> : vector<4x32xf32>
    %2 = tpu.matmul %0, %1, %cst {dimension_numbers = #tpu.dot_dimension_numbers<[1], [0], [0], [1], [0, 0, 1, 1], [], []>} : vector<4x16xbf16>, vector<16x32xbf16>, vector<4x32xf32> -> vector<4x32xf32>
    %cst_3 = arith.constant 0.000000e+00 : f32
    %3 = vector.broadcast %cst_3 : f32 to vector<4x32xf32>
    %4 = arith.maximumf %2, %3 : vector<4x32xf32>
    %5 = arith.truncf %4 : vector<4x32xf32> to vector<4x32xbf16>
    %c0_4 = arith.constant 0 : index
    %c0_5 = arith.constant 0 : index
    %6 = vector.load %arg3[%c0_4, %c0_5] : memref<32x8xbf16, #tpu.memory_space<vmem>>, vector<32x8xbf16>
    %cst_6 = arith.constant dense<0.000000e+00> : vector<4x8xf32>
    %7 = tpu.matmul %5, %6, %cst_6 {dimension_numbers = #tpu.dot_dimension_numbers<[1], [0], [0], [1], [0, 0, 1, 1], [], []>} : vector<4x32xbf16>, vector<32x8xbf16>, vector<4x8xf32> -> vector<4x8xf32>
    %cst_7 = arith.constant dense<0xFF800000> : vector<4xf32>
    %8 = vector.multi_reduction <maximumf>, %7, %cst_7 [1] : vector<4x8xf32> to vector<4xf32>
    %9 = vector.shape_cast %8 : vector<4xf32> to vector<4x1xf32>
    %10 = vector.broadcast %9 : vector<4x1xf32> to vector<4x8xf32>
    %11 = arith.subf %7, %10 : vector<4x8xf32>
    %12 = math.exp %11 : vector<4x8xf32>
    %cst_8 = arith.constant dense<0.000000e+00> : vector<4xf32>
    %13 = vector.multi_reduction <add>, %12, %cst_8 [1] : vector<4x8xf32> to vector<4xf32>
    %14 = vector.shape_cast %13 : vector<4xf32> to vector<4x1xf32>
    %15 = vector.broadcast %14 : vector<4x1xf32> to vector<4x8xf32>
    %16 = arith.divf %12, %15 : vector<4x8xf32>
    %c0_9 = arith.constant 0 : index
    %c0_10 = arith.constant 0 : index
    %17 = vector.load %arg4[%c0_9, %c0_10] : memref<4x8xf32, #tpu.memory_space<vmem>>, vector<4x8xf32>
    tpu.vector_store %arg4[%c0_9, %c0_10], %16 {strides = array<i32>} : memref<4x8xf32, #tpu.memory_space<vmem>>, vector<4x8xf32>,
    return
  }
  func.func @transform_0(%arg0: i32) -> (i32, i32) {
    %c0_i32 = arith.constant 0 : i32
    %c0_i32_0 = arith.constant 0 : i32
    return %arg0, %c0_i32 : i32, i32
  }
  func.func @transform_1(%arg0: i32) -> (i32, i32) {
    %c0_i32 = arith.constant 0 : i32
    %c0_i32_0 = arith.constant 0 : i32
    %c0_i32_1 = arith.constant 0 : i32
    return %c0_i32, %c0_i32_0 : i32, i32
  }
  func.func @transform_2(%arg0: i32) -> (i32, i32) {
    %c0_i32 = arith.constant 0 : i32
    %c0_i32_0 = arith.constant 0 : i32
    %c0_i32_1 = arith.constant 0 : i32
    return %c0_i32, %c0_i32_0 : i32, i32
  }
  func.func @transform_3(%arg0: i32) -> (i32, i32) {
    %c0_i32 = arith.constant 0 : i32
    %c0_i32_0 = arith.constant 0 : i32
    return %arg0, %c0_i32 : i32, i32
  }
}

</mosaic_0001>

<bundles_post_ra>
// kernel: tpu_custom_call.1
= control target key start
LH: loop header
LB: loop body
LE: loop exit
PB: predicated region body
PF: predicated region fallthrough
CT: control target
= control target key end

     0   :  { %v216_v1 = vmov 0.0   ;;  %vm217_vm0 = vmmov 0   ;;  %vm25_vm1 = vcmask 130048   ;;  %s266_s0 = inlined_call_operand.vmem [shape: bf16[4,16], index: 0, kind: input, shape index: {}]   ;;  %s267_s1 = inlined_call_operand.vmem [shape: bf16[16,32], index: 1, kind: input, shape index: {}]   ;;  %s268_s2 = inlined_call_operand.vmem [shape: bf16[32,8], index: 2, kind: input, shape index: {}]   ;;  %s269_s3 = inlined_call_operand.hbm [shape: f32[4,8], index: 3, kind: output, shape index: {}]  }
   0x1   :  { %v185_v0 = vld [vmem:[%s267_s1] sm:$0xff]   ;;  %168 = vmatprep.subr.bf16.mxu0 %v216_v1  ;;  %174 = vmatprep.subr.bf16.mxu1 %v216_v1 }
   0x2   :  { %v16_v2 = vld [vmem:[%s266_s0] sm:$0x3]  ;;  %169 = vmatpush3.bf16.msra.mxu0 %v185_v0  ;;  %170 = vmatprep.mubr.msk.bf16.mxu0 %vm217_vm0, %v216_v1 }
   0x3   :  { %v186_v3 = vld [vmem:[%s268_s2] sm:$0xff]   ;;  %178 = vmatprep.mubr.msk.bf16.mxu1 %vm217_vm0, %v216_v1 }
   0x4   :  { %8 = vsyncpa [#allocation3], 0  ;;  %175 = vmatpush3.bf16.msra.mxu1 %v186_v3  ;;  %v187_v4 = vld [vmem:[%s268_s2 + $0x8] sm:$0xff]   ;;  %vm87_vm2 = vcmask 261120   ;;  %vm131_vm3 = vcmask 60416   ;;  %s218_s0 = smov [#allocation2]  }
   0x5   :  { %171 = vmatmul.mubr.msk.bf16.vlgmr.msra.gmra.mrb[0].mxu0 %vm25_vm1, %v16_v2  ;;  %176 = vmatprep.subr.bf16.mxu1 %v216_v1  ;;  %s150_s2 = sshll.u32 %s218_s0, 4  ;;  %s151_s2 = int_to_ptr.vmem [resolvable:$true] %s150_s2 }
   0x6   :  { %s192_s19 = scalar_lea.vmem %s151_s2, 64  ;;  %p197_p1 = scmp.lt.s32.totalorder %s151_s2, %s151_s2 }
   0x7   :  { %p193_p0 = scmp.ne.s32.totalorder %s151_s2, %s192_s19  ;;  %p198_p2 = scmp.lt.s32.totalorder %s192_s19, %s192_s19 }
   0x8   :  { %177 = vmatpush3.bf16.msra.mxu1 %v187_v4 }
   0x9   :  { %p199_p3 = por %p198_p2, %p197_p1 }
   0xb   :  { %p200_p4 = pnand %p199_p3, %p193_p0 }
  0xd8   :  { %v63_v5 = vpop.f32.mrb[0].mxu0 }
  0xd9   :  { %v69_v6 = vmax.f32 %v63_v5, 0.0  ;;  %v172_v7 = vpop.f32.mrb[1].mxu0 }
  0xda   :  { %v66_v8 = vpop.f32.mrb[2].mxu0 }
  0xdb   :  { %v70_v9 = vpack.c.bf16 %v69_v6, %v69_v6  ;;  %v173_v10 = vpop.f32.mrb[3].mxu0 }
  0xdd   :  { %179 = vmatmul.mubr.msk.bf16.vlgmr.msra.gmra.mrb[0].mxu1 %vm87_vm2, %v70_v9 }
 0x1b0   :  { %v125_v11 = vpop.f32.mrb[0].mxu1 }
 0x1b1   :  { %v180_v12 = vpop.f32.mrb[1].mxu1  ;;  %v132_v13 = vsel %vm131_vm3, %v125_v11, -inf }
 0x1b2   :  { %133 = vmax.xlane.f32.xlu0 %v132_v13  ;;  %v128_v14 = vpop.f32.mrb[2].mxu1 }
 0x1b3   :  { %v181_v15 = vpop.f32.mrb[3].mxu1 }
 0x23f   :  { %v134_v16 = vpop.xlane.xlu0 %133 }
 0x240   :  { %v135_v17 = vsub.f32 %v125_v11, %v134_v16 }
 0x242   :  { %v136_v18 = vmul.f32 1.442695, %v135_v17 }
 0x244   :  { %188 = vpow2.f32 %v136_v18 }
 0x24e   :  { %v189_v19 = vpop.eup %188 }
 0x24f   :  { %v138_v20 = vsel %vm131_vm3, %v189_v19, 0.0 }
 0x250   :  { %139 = vadd.xlane.f32.xlu0 %v138_v20 }
 0x2dd   :  { %v140_v21 = vpop.xlane.xlu0 %139 }
 0x2de   :  { %190 = vrcp.f32 %v140_v21 }
 0x2e8   :  { %v191_v22 = vpop.eup %190 }
 0x2e9   :  { %v142_v23 = vmul.f32 %v191_v22, %v189_v19 }
 0x2eb   :  { %143 = vst.msk [vmem:[#allocation2] sm:$0xf] %vm131_vm3, %v142_v23 }
 0x2ec   :  { %203 = shalt.err (!%p200_p4)
}
 0x2ed   :  { %s204_s22 = scalar_lea.hbm %s269_s3, 64 }
 0x2ee   :  { %p205_p5 = scmp.ne.s32.totalorder %s269_s3, %s204_s22  ;;  %p208_p6 = scmp.lt.u32.totalorder %s204_s22, %s269_s3 }
 0x2f0   :  { %p210_p7 = pnand %p208_p6, %p205_p5 }
 0x2f2   :  { %213 = shalt.err (!%p210_p7)
}
 0x2f3   :  { %153 = dma.vmem_to_hbm [thread:$0]  %s151_s2, 64, %s269_s3, [#allocation3]  }
 0x2f4   :  { %214 = dma.done.wait [#allocation3], 64  }
 0x2f5   :  { %215 = vsyncadd [#allocation3], 4294967232 }
 0x2f6   :  { %157 = vsyncpa [#allocation3], 1 }

</bundles_post_ra>
